<compile_context>
chip_gen: v7x
topology: tpu7x:2x2x1
jax: 0.10.0
libtpu: 0.0.40
codegen_flags: <defaults>
</compile_context>

<pallas_src>
import functools
import itertools

import numpy as np
import jax
import jax.numpy as jnp
from jax.experimental import pallas as pl
from jax.experimental.pallas import tpu as pltpu

try:  # exact Hungarian solver if available; brute-force fallback otherwise
    from scipy.optimize import linear_sum_assignment as _lsa
except Exception:  # pragma: no cover
    _lsa = None

_LANE = 128          # NPR tile (lane axis)
_NT_SUBLANE = 16     # target padding granularity (bf16 sublane packing)
_TP_CAP = 8192       # cap on the spatial reduction tile


def _round_up(x, m):
    return ((x + m - 1) // m) * m


def _choose_p_tiling(p_dim, cap=_TP_CAP):
    """Pick (tp, p_pad): tp is a 128-multiple <= cap and p_pad = n_k * tp >= p_dim."""
    p128 = _round_up(p_dim, 128)
    if p128 <= cap:
        return p128, p128
    n_k = -(-p128 // cap)                       # ceil
    tp = _round_up(-(-p128 // n_k), 128)
    return tp, n_k * tp


# ----------------------------------------------------------------------------
# Pallas kernel: batched pairwise binary-cross-entropy cost matrices
# ----------------------------------------------------------------------------
def _pairwise_bce_cost_kernel(pred_ref, targ_ref, cost_ref, row_acc, *, inv_p):
    """One (batch b, NPR block i, reduction chunk k) grid step.

    pred_ref: (1, TP, 128)      bf16 probabilities, P on sublanes, NPR on lanes
                                (P padded with 0.0, NPR padded with 0.0)
    targ_ref: (1, NT_PAD, TP)   bf16 {0,1} masks (zero-padded rows / columns)
    cost_ref: (1, NT_PAD, 128)  f32 transposed cost; resident across k, used as
                                the matmul accumulator
    row_acc:  (1, 128)          f32 accumulator of sum_P log(1-p) per slot
    """
    k = pl.program_id(2)

    @pl.when(k == 0)
    def _():
        cost_ref[...] = jnp.zeros_like(cost_ref)
        row_acc[...] = jnp.zeros_like(row_acc)

    p = pred_ref[0].astype(jnp.float32)                 # (TP, 128) f32
    # PyTorch F.binary_cross_entropy clamps each log term at -100.
    log_p = jnp.maximum(jnp.log(p), -100.0)
    log_1mp = jnp.maximum(jnp.log(1.0 - p), -100.0)

    # bf16 MXU operands, f32 accumulation; canonical (M,K)@(K,N) -> no transposes.
    logit = (log_p - log_1mp).astype(jnp.bfloat16)      # (TP, 128)
    t = targ_ref[0]                                     # (NT_PAD, TP) bf16
    cost_ref[0] += jnp.dot(t, logit, preferred_element_type=jnp.float32)
    row_acc[...] += jnp.sum(log_1mp, axis=0, keepdims=True)   # (1, 128)

    @pl.when(k == pl.num_programs(2) - 1)
    def _():
        cost_ref[0] = -(cost_ref[0] + row_acc[...]) * inv_p


@functools.lru_cache(maxsize=None)
def _build_pairwise_bce_cost(b, nt_pad, npr_pad, p_pad, tp, p_dim):
    n_i = npr_pad // _LANE
    n_k = p_pad // tp
    kernel = functools.partial(_pairwise_bce_cost_kernel, inv_p=1.0 / p_dim)
    call = pl.pallas_call(
        kernel,
        out_shape=jax.ShapeDtypeStruct((b, nt_pad, npr_pad), jnp.float32),
        grid_spec=pltpu.PrefetchScalarGridSpec(
            num_scalar_prefetch=0,
            grid=(b, n_i, n_k),
            in_specs=[
                # pred: (B, P_pad, NPR_pad) bf16
                pl.BlockSpec((1, tp, _LANE), lambda bi, ii, ki: (bi, ki, ii)),
                # targets: (B, NT_pad, P_pad) bf16
                pl.BlockSpec((1, nt_pad, tp), lambda bi, ii, ki: (bi, 0, ki)),
            ],
            out_specs=pl.BlockSpec((1, nt_pad, _LANE),
                                   lambda bi, ii, ki: (bi, 0, ii)),
            scratch_shapes=[pltpu.VMEM((1, _LANE), jnp.float32)],
        ),
        compiler_params=pltpu.CompilerParams(
            # batch and NPR-block axes are parallel (megacore on multi-TC chips);
            # the reduction axis is last and "arbitrary" (output is resident).
            dimension_semantics=("parallel", "parallel", "arbitrary"),
            vmem_limit_bytes=48 * 1024 * 1024,
        ),
    )
    return jax.jit(call)


def pairwise_bce_cost_batched(pred_t, targ, p_dim):
    """pred_t: (B, P_pad, NPR_pad) bf16 probs; targ: (B, NT_pad, P_pad) bf16 {0,1}.

    Returns (B, NT_pad, NPR_pad) f32 TRANSPOSED cost matrices (one pallas_call).
    """
    b, p_pad, npr_pad = pred_t.shape
    nt_pad = targ.shape[1]
    tp, p_pad_chk = _choose_p_tiling(p_dim)
    assert p_pad_chk == p_pad, "prediction padding does not match the P tiling"
    fn = _build_pairwise_bce_cost(b, nt_pad, npr_pad, p_pad, tp, p_dim)
    return fn(pred_t, targ)


def _batched_cost_matrices(predictions, kept_targets):
    """Stage inputs in the transfer dtype/layout, run the kernel, slice padding.

    predictions:  (B, NPR, H, W) float32 numpy, probabilities in (0, 1)
    kept_targets: list of B arrays, each (nt_i, H, W) bool/float (empty masks
                  already removed)
    Returns a list of B float32 numpy cost matrices of shape (NPR, nt_i).
    """
    b, npr, h, w = predictions.shape
    p_dim = h * w
    tp, p_pad = _choose_p_tiling(p_dim)
    npr_pad = _round_up(npr, _LANE)
    # TODO(synk): for B == 1 with NPR <= 128 only one NPR block exists, so one
    # v7x TensorCore idles; padding NPR to 256 in that case would fix it at the
    # cost of 2x pred DMA.
    nts = [int(t.shape[0]) for t in kept_targets]
    nt_pad = _round_up(max(max(nts), 1), _NT_SUBLANE)

    # Predictions transposed so NPR sits on lanes; built directly in bf16.
    # Pad value 0.0 everywhere: log(1-0)=0 keeps rowsum exact for padded P rows
    # and padded NPR lanes are sliced off below.
    pred_t = np.zeros((b, p_pad, npr_pad), dtype=jnp.bfloat16)
    pred_t[:, :p_dim, :npr] = (
        predictions.reshape(b, npr, p_dim).transpose(0, 2, 1).astype(jnp.bfloat16)
    )

    # Targets: small NT on sublanes, staged directly in bf16 (exact for {0,1}).
    targ = np.zeros((b, nt_pad, p_pad), dtype=jnp.bfloat16)
    for i, t in enumerate(kept_targets):
        if t.shape[0] > 0:
            targ[i, : t.shape[0], :p_dim] = (
                t.reshape(t.shape[0], p_dim).astype(np.float32).astype(jnp.bfloat16)
            )

    # One device call + one sync for the whole batch.
    cost_t = pairwise_bce_cost_batched(jnp.asarray(pred_t), jnp.asarray(targ), p_dim)
    cost_t = np.asarray(jax.block_until_ready(cost_t))  # (B, NT_pad, NPR_pad)

    # Slice away padded rows/columns BEFORE any downstream use (padded entries
    # carry finite garbage cost) and undo the orientation swap.
    return [np.ascontiguousarray(cost_t[i, : nts[i], :npr].T) for i in range(b)]


# ----------------------------------------------------------------------------
# Host-side glue (mirrors the PyTorch forward)
# ----------------------------------------------------------------------------
def _bce_with_logits(x, y):
    # numerically stable elementwise BCE-with-logits (numpy)
    return np.maximum(x, 0.0) - x * y + np.log1p(np.exp(-np.abs(x)))


def _hungarian(cost):
    """Minimum-cost bipartite matching. Returns binary matching matrix."""
    npr, nt = cost.shape
    mm = np.zeros((npr, nt), dtype=np.float32)
    if npr == 0 or nt == 0:
        return mm
    if _lsa is not None:
        rows, cols = _lsa(cost)
        mm[rows, cols] = 1.0
        return mm
    # brute-force fallback (only for tiny problems)
    if nt <= npr:
        best_val, best_perm = None, None
        for perm in itertools.permutations(range(npr), nt):
            s = sum(cost[perm[j], j] for j in range(nt))
            if best_val is None or s < best_val:
                best_val, best_perm = s, perm
        for j, i in enumerate(best_perm):
            mm[i, j] = 1.0
    else:
        best_val, best_perm = None, None
        for perm in itertools.permutations(range(nt), npr):
            s = sum(cost[i, perm[i]] for i in range(npr))
            if best_val is None or s < best_val:
                best_val, best_perm = s, perm
        for i, j in enumerate(best_perm):
            mm[i, j] = 1.0
    return mm


def detr_seg_loss(input_mask, target_mask, foreground_logits=None,
                  loss_weight=1.0, ignore_background=True,
                  foreground_weight=1.0, foreground_matching_weight=1.0):
    """JAX/Pallas reimplementation of DETRSegLoss.forward (single host).

    input_mask:        (B, NPR, H, W) predicted mask probabilities in (0, 1)
    target_mask:       (B, NT,  H, W) target masks (any float; thresholded at > 0)
    foreground_logits: (B, NPR, 1) or None
    """
    target_bool = np.asarray(target_mask) > 0  # target_mask.detach() > 0
    # valid_targets = ~isnan(...)... -> boolean tensors have no NaNs, so every
    # sample is valid (matches the PyTorch behaviour on non-NaN data).
    valid = np.ones(target_bool.shape[0], dtype=bool)

    if ignore_background:
        target_bool = target_bool[:, 1:]

    targets = target_bool[valid]
    predictions = np.asarray(input_mask, dtype=np.float32)[valid]
    fg = None
    if foreground_logits is not None:
        fg = np.asarray(foreground_logits, dtype=np.float32)[valid]

    b_valid = predictions.shape[0]
    if b_valid == 0:
        return 0.0

    # Per-sample empty-mask filtering (data-dependent, stays on the host).
    kept = []
    for i in range(b_valid):
        t = targets[i]
        kept.append(t[t.reshape(t.shape[0], -1).sum(-1) > 0])

    # Batched Pallas cost matrices: single device call + single sync.
    cost_list = _batched_cost_matrices(predictions, kept)

    total_loss = 0.0
    num_samples = 0
    for i in range(b_valid):
        nt = int(kept[i].shape[0])
        cost_seg = cost_list[i]                                   # (NPR, nt)

        # matching cost (foreground term gated by foreground_matching_weight)
        if fg is not None and foreground_matching_weight != 0.0:
            logits = fg[i]                                        # (NPR, 1)
            fg_match = _bce_with_logits(logits, np.ones_like(logits))
            cost_total = cost_seg + foreground_weight * fg_match
        else:
            cost_total = cost_seg

        matching_matrix = _hungarian(cost_total)

        # NOTE: replicates the original module exactly: predictions.shape[0]
        # is the number of valid *batch samples*, not prediction slots.
        n_matches = min(predictions.shape[0], nt)
        if n_matches > 0:
            instance_cost = float((cost_seg * matching_matrix).sum()) / n_matches
        else:
            instance_cost = 0.0

        if fg is not None:
            ismatched = (matching_matrix > 0).any(-1).astype(np.float32)  # (NPR,)
            logits = fg[i].squeeze(-1)                                    # (NPR,)
            instance_cost += foreground_weight * float(
                _bce_with_logits(logits, ismatched).mean()
            )

        total_loss += instance_cost
        num_samples += 1

    # TODO(synk): multi-device all_gather branch (global_loss, world_size > 1)
    # has no equivalent in this single-host setup.
    if num_samples == 0:
        return 0.0
    return (total_loss / num_samples) * loss_weight


# ----------------------------------------------------------------------------
# Reference (pure numpy, f64) cost matrix, used to validate the Pallas kernel
# ----------------------------------------------------------------------------
def _cost_matrix_ref(pred, targ):
    # pred: (NPR, H, W) probs; targ: (NT, H, W) {0,1}
    npr = pred.shape[0]
    nt = targ.shape[0]
    out = np.zeros((npr, nt), dtype=np.float32)
    for a in range(npr):
        for b in range(nt):
            p = pred[a].astype(np.float64)
            t = targ[b].astype(np.float64)
            lp = np.maximum(np.log(p), -100.0)
            ln = np.maximum(np.log(1.0 - p), -100.0)
            out[a, b] = -(t * lp + (1.0 - t) * ln).mean()
    return out


if __name__ == "__main__":
    B, NPR, H, W = 2, 8, 16, 16
    NT_RAW = 6  # background + 5 object channels

    key = jax.random.PRNGKey(0)
    k1, k2, k3 = jax.random.split(key, 3)

    # predicted masks: softmax over the slot axis -> probabilities in (0,1)
    logits_mask = jax.random.normal(k1, (B, NPR, H, W), dtype=jnp.float32)
    input_mask = jax.nn.softmax(logits_mask, axis=1)

    # target masks: random binary masks; channel 0 is background, and one object
    # channel is left empty to exercise the empty-mask filtering path
    target_mask = (jax.random.uniform(k2, (B, NT_RAW, H, W)) > 0.7).astype(jnp.float32)
    target_mask = target_mask.at[0, 3].set(0.0)  # empty object mask in sample 0

    foreground_logits = jax.random.normal(k3, (B, NPR, 1), dtype=jnp.float32)

    # --- correctness check of the batched Pallas cost kernel against numpy ---
    preds_np = np.asarray(input_mask, dtype=np.float32)
    targs_np = np.asarray(target_mask)[:, 1:] > 0  # drop background
    kept = []
    for i in range(B):
        t = targs_np[i]
        kept.append(t[t.reshape(t.shape[0], -1).sum(-1) > 0])

    costs = _batched_cost_matrices(preds_np, kept)
    for i in range(B):
        if kept[i].shape[0] == 0:
            continue
        ref_i = _cost_matrix_ref(preds_np[i], kept[i].astype(np.float32))
        # bf16 pred + bf16 MXU logit operand -> ~0.5% relative error budget
        np.testing.assert_allclose(
            costs[i], ref_i, rtol=2e-2, atol=2e-2,
            err_msg="Pallas cost matrix mismatch",
        )

    loss = detr_seg_loss(input_mask, target_mask, foreground_logits)
    _ = jax.block_until_ready(jnp.asarray(loss))
    print("KERNEL_OK")
</pallas_src>

<mosaic_0001>
module attributes {stable_mosaic.version = 11 : i64} {
  func.func @_pairwise_bce_cost_kernel(%arg0: i32, %arg1: i32, %arg2: i32, %arg3: memref<1x256x128xbf16, #tpu.memory_space<vmem>>, %arg4: memref<1x16x256xbf16, #tpu.memory_space<vmem>>, %arg5: memref<1x16x128xf32, #tpu.memory_space<vmem>>, %arg6: memref<1x128xf32, #tpu.memory_space<vmem>>) attributes {dimension_semantics = [#tpu.dimension_semantics<parallel>, #tpu.dimension_semantics<parallel>, #tpu.dimension_semantics<arbitrary>], iteration_bounds = array<i64: 2, 1, 1>, scalar_prefetch = 0 : i64, scratch_operands = 1 : i64, tpu.core_type = #tpu.core_type<tc>, window_params = [{transform_indices = @transform_0, window_bounds = array<i64: 1, 256, 128>}, {transform_indices = @transform_1, window_bounds = array<i64: 1, 16, 256>}, {transform_indices = @transform_2, window_bounds = array<i64: 1, 16, 128>}]} {
    %c0_i32 = arith.constant 0 : i32
    %0 = arith.cmpi eq, %arg2, %c0_i32 : i32
    %1 = arith.extui %0 : i1 to i32
    %c0_i32_0 = arith.constant 0 : i32
    %2 = arith.cmpi ne, %1, %c0_i32_0 : i32
    scf.if %2 {
      %cst_22 = arith.constant 0.000000e+00 : f32
      %33 = vector.broadcast %cst_22 : f32 to vector<1x16x128xf32>
      %c0_23 = arith.constant 0 : index
      %c0_24 = arith.constant 0 : index
      %c0_25 = arith.constant 0 : index
      %34 = vector.load %arg5[%c0_23, %c0_24, %c0_25] : memref<1x16x128xf32, #tpu.memory_space<vmem>>, vector<1x16x128xf32>
      tpu.vector_store %arg5[%c0_23, %c0_24, %c0_25], %33 {strides = array<i32>} : memref<1x16x128xf32, #tpu.memory_space<vmem>>, vector<1x16x128xf32>,
      %cst_26 = arith.constant 0.000000e+00 : f32
      %35 = vector.broadcast %cst_26 : f32 to vector<1x128xf32>
      %c0_27 = arith.constant 0 : index
      %c0_28 = arith.constant 0 : index
      %36 = vector.load %arg6[%c0_27, %c0_28] : memref<1x128xf32, #tpu.memory_space<vmem>>, vector<1x128xf32>
      tpu.vector_store %arg6[%c0_27, %c0_28], %35 {strides = array<i32>} : memref<1x128xf32, #tpu.memory_space<vmem>>, vector<1x128xf32>,
    } else {
    }
    %c0 = arith.constant 0 : index
    %c0_1 = arith.constant 0 : index
    %c0_2 = arith.constant 0 : index
    %3 = vector.load %arg3[%c0, %c0_1, %c0_2] : memref<1x256x128xbf16, #tpu.memory_space<vmem>>, vector<1x256x128xbf16>
    %4 = vector.shape_cast %3 : vector<1x256x128xbf16> to vector<256x128xbf16>
    %5 = arith.extf %4 : vector<256x128xbf16> to vector<256x128xf32>
    %6 = math.log %5 : vector<256x128xf32>
    %cst = arith.constant -1.000000e+02 : f32
    %7 = vector.broadcast %cst : f32 to vector<256x128xf32>
    %8 = arith.maximumf %6, %7 : vector<256x128xf32>
    %cst_3 = arith.constant 1.000000e+00 : f32
    %9 = vector.broadcast %cst_3 : f32 to vector<256x128xf32>
    %10 = arith.subf %9, %5 : vector<256x128xf32>
    %11 = math.log %10 : vector<256x128xf32>
    %cst_4 = arith.constant -1.000000e+02 : f32
    %12 = vector.broadcast %cst_4 : f32 to vector<256x128xf32>
    %13 = arith.maximumf %11, %12 : vector<256x128xf32>
    %14 = arith.subf %8, %13 : vector<256x128xf32>
    %15 = arith.truncf %14 : vector<256x128xf32> to vector<256x128xbf16>
    %c0_5 = arith.constant 0 : index
    %c0_6 = arith.constant 0 : index
    %c0_7 = arith.constant 0 : index
    %16 = vector.load %arg4[%c0_5, %c0_6, %c0_7] : memref<1x16x256xbf16, #tpu.memory_space<vmem>>, vector<1x16x256xbf16>
    %17 = vector.shape_cast %16 : vector<1x16x256xbf16> to vector<16x256xbf16>
    %c0_8 = arith.constant 0 : index
    %c0_9 = arith.constant 0 : index
    %c0_10 = arith.constant 0 : index
    %18 = vector.load %arg5[%c0_8, %c0_9, %c0_10] : memref<1x16x128xf32, #tpu.memory_space<vmem>>, vector<1x16x128xf32>
    %19 = vector.shape_cast %18 : vector<1x16x128xf32> to vector<16x128xf32>
    %cst_11 = arith.constant dense<0.000000e+00> : vector<16x128xf32>
    %20 = tpu.matmul %17, %15, %cst_11 {dimension_numbers = #tpu.dot_dimension_numbers<[1], [0], [0], [1], [0, 0, 1, 1], [], []>} : vector<16x256xbf16>, vector<256x128xbf16>, vector<16x128xf32> -> vector<16x128xf32>
    %21 = arith.addf %19, %20 : vector<16x128xf32>
    %c0_12 = arith.constant 0 : index
    %c0_13 = arith.constant 0 : index
    %c0_14 = arith.constant 0 : index
    %22 = vector.load %arg5[%c0_12, %c0_13, %c0_14] : memref<1x16x128xf32, #tpu.memory_space<vmem>>, vector<1x16x128xf32>
    %23 = vector.shape_cast %22 : vector<1x16x128xf32> to vector<16x128xf32>
    %24 = vector.shape_cast %21 : vector<16x128xf32> to vector<1x16x128xf32>
    tpu.vector_store %arg5[%c0_12, %c0_13, %c0_14], %24 {strides = array<i32>} : memref<1x16x128xf32, #tpu.memory_space<vmem>>, vector<1x16x128xf32>,
    %c0_15 = arith.constant 0 : index
    %c0_16 = arith.constant 0 : index
    %25 = vector.load %arg6[%c0_15, %c0_16] : memref<1x128xf32, #tpu.memory_space<vmem>>, vector<1x128xf32>
    %cst_17 = arith.constant dense<0.000000e+00> : vector<128xf32>
    %26 = vector.multi_reduction <add>, %13, %cst_17 [0] : vector<256x128xf32> to vector<128xf32>
    %27 = vector.shape_cast %26 : vector<128xf32> to vector<1x128xf32>
    %28 = arith.addf %25, %27 : vector<1x128xf32>
    %c0_18 = arith.constant 0 : index
    %c0_19 = arith.constant 0 : index
    %29 = vector.load %arg6[%c0_18, %c0_19] : memref<1x128xf32, #tpu.memory_space<vmem>>, vector<1x128xf32>
    tpu.vector_store %arg6[%c0_18, %c0_19], %28 {strides = array<i32>} : memref<1x128xf32, #tpu.memory_space<vmem>>, vector<1x128xf32>,
    %c0_i32_20 = arith.constant 0 : i32
    %30 = arith.cmpi eq, %arg2, %c0_i32_20 : i32
    %31 = arith.extui %30 : i1 to i32
    %c0_i32_21 = arith.constant 0 : i32
    %32 = arith.cmpi ne, %31, %c0_i32_21 : i32
    scf.if %32 {
      %c0_22 = arith.constant 0 : index
      %c0_23 = arith.constant 0 : index
      %c0_24 = arith.constant 0 : index
      %33 = vector.load %arg5[%c0_22, %c0_23, %c0_24] : memref<1x16x128xf32, #tpu.memory_space<vmem>>, vector<1x16x128xf32>
      %34 = vector.shape_cast %33 : vector<1x16x128xf32> to vector<16x128xf32>
      %c0_25 = arith.constant 0 : index
      %c0_26 = arith.constant 0 : index
      %35 = vector.load %arg6[%c0_25, %c0_26] : memref<1x128xf32, #tpu.memory_space<vmem>>, vector<1x128xf32>
      %36 = vector.broadcast %35 : vector<1x128xf32> to vector<16x128xf32>
      %37 = arith.addf %34, %36 : vector<16x128xf32>
      %cst_27 = arith.constant 0.000000e+00 : f32
      %38 = vector.broadcast %cst_27 : f32 to vector<16x128xf32>
      %39 = arith.subf %38, %37 : vector<16x128xf32>
      %cst_28 = arith.constant 3.906250e-03 : f32
      %40 = vector.broadcast %cst_28 : f32 to vector<16x128xf32>
      %41 = arith.mulf %39, %40 : vector<16x128xf32>
      %c0_29 = arith.constant 0 : index
      %c0_30 = arith.constant 0 : index
      %c0_31 = arith.constant 0 : index
      %42 = vector.load %arg5[%c0_29, %c0_30, %c0_31] : memref<1x16x128xf32, #tpu.memory_space<vmem>>, vector<1x16x128xf32>
      %43 = vector.shape_cast %42 : vector<1x16x128xf32> to vector<16x128xf32>
      %44 = vector.shape_cast %41 : vector<16x128xf32> to vector<1x16x128xf32>
      tpu.vector_store %arg5[%c0_29, %c0_30, %c0_31], %44 {strides = array<i32>} : memref<1x16x128xf32, #tpu.memory_space<vmem>>, vector<1x16x128xf32>,
    } else {
    }
    return
  }
  func.func @transform_0(%arg0: i32, %arg1: i32, %arg2: i32) -> (i32, i32, i32) {
    %c0_i32 = arith.constant 0 : i32
    return %arg0, %arg2, %arg1 : i32, i32, i32
  }
  func.func @transform_1(%arg0: i32, %arg1: i32, %arg2: i32) -> (i32, i32, i32) {
    %c0_i32 = arith.constant 0 : i32
    %c0_i32_0 = arith.constant 0 : i32
    return %arg0, %c0_i32, %arg2 : i32, i32, i32
  }
  func.func @transform_2(%arg0: i32, %arg1: i32, %arg2: i32) -> (i32, i32, i32) {
    %c0_i32 = arith.constant 0 : i32
    %c0_i32_0 = arith.constant 0 : i32
    return %arg0, %c0_i32, %arg1 : i32, i32, i32
  }
}

</mosaic_0001>

<bundles_post_ra>
// kernel: tpu_custom_call.1
= control target key start
LH: loop header
LB: loop body
LE: loop exit
PB: predicated region body
PF: predicated region fallthrough
CT: control target
= control target key end

     0   :  { %7 = vsyncpa [#allocation4], 0  ;;  %s1921_s0 = inlined_call_operand.hbm [shape: bf16[2,256,128], index: 0, kind: input, shape index: {}]   ;;  %s1922_s1 = inlined_call_operand.hbm [shape: bf16[2,16,256], index: 1, kind: input, shape index: {}]   ;;  %s1923_s2 = inlined_call_operand.hbm [shape: f32[2,16,128], index: 2, kind: output, shape index: {}]  }
   0x1   :  { %9 = vsyncpa [#allocation4 + $0x1], 0 }
   0x2   :  { %10 = vsyncpa [#allocation7], 0 }
   0x3   :  { %12 = vsyncpa [#allocation7 + $0x1], 0 }
   0x4   :  { %13 = vsyncpa [#allocation5], 0 }
   0x5   :  { %15 = vsyncpa [#allocation5 + $0x1], 0  ;;  %s1334_s9 = smov 0   ;;  %s1336_s10 = smov 0  }
   0x6   :  { %s1338_s11 = smov 0   ;;  %s1340_s12 = smov 0  }
   0x7   :  { %s1342_s13 = smov 0   ;;  %s1344_s14 = smov 0  }
   0x8 LB: > { %s830_s15 = sadd.s32 4294967295, %s1307_s14   ;;  %s831_s16 = sadd.s32 4294967294, %s1307_s14   ;;  %s1307_s14 = sphi %s1344_s14, %s21_s14   ;;  %s1303_s13 = sphi %s1342_s13, %s1973_s13   ;;  %s1299_s12 = sphi %s1340_s12, %s1972_s12   ;;  %s1295_s11 = sphi %s1338_s11, %s1971_s11   ;;  %s1291_s10 = sphi %s1336_s10, %s1970_s10   ;;  %s1287_s9 = sphi %s1334_s9, %s1969_s9  }
   0x9   : > { %s40_s17 = sadd.s32 1, %s1303_s13  ;;  %s51_s18 = sadd.s32 1, %s1295_s11 }
   0xa   : > { %p42_p0 = scmp.ge.s32.totalorder %s40_s17, 2  ;;  %p58_p1 = scmp.ne.s32.totalorder %s1295_s11, %s1291_s10 }
   0xb   : > { %p59_p2 = scmp.eq.s32.totalorder %s1307_s14, 0  ;;  %p64_p3 = scmp.ne.s32.totalorder %s1291_s10, %s1287_s9 }
   0xc   : > { %s1975_s17 = smov (%p42_p0, %s40_s17), 0  ;;  %p65_p5 = scmp.eq.s32.totalorder %s830_s15, 0 }
   0xd   : > { %p1375_p4 = por %p59_p2, %p58_p1  ;;  %s44_s20 = ssub.s32 %s1303_s13, %s1975_s17 }
   0xe   : > { %p118_p6 = scmp.eq.s32.totalorder %s830_s15, 1  ;;  %p49_p7 = scmp.eq.s32.totalorder %s44_s20, 0 }
   0xf   : > { %p1381_p8 = por %p65_p5, %p64_p3  ;;  %p124_p10 = scmp.eq.s32.totalorder %s831_s16, 1 }
  0x10   : > { %p1385_p9 = por %p118_p6, %p58_p1  ;;  %p973_p13 = scmp.lt.s32.totalorder %s1307_s14, 2 }
  0x11   : > { %s1942_s21 = scalar_select %p1381_p8, 1, 0 }
  0x12   : > { %s1943_s22 = scalar_select %p1385_p9, 1, 0 }
  0x13   : > { %s1390_s23 = scalar_select %p49_p7, %s1295_s11, %s51_s18  }
  0x14   : > { %p1392_p11 = por %p124_p10, %p64_p3  ;;  %s1399_s25 = sand.u32 1, %s1295_s11  }
  0x15   : > { %s834_s26 = sshll.u32 %s1399_s25, 7  ;;  %s852_s27 = sshll.u32 %s1303_s13, 11 }
  0x16   : > { %s1944_s24 = scalar_select %p1392_p11, 1, 0 }
  0x17   : > { %s1406_s30 = scalar_lea.hbm %s1921_s0, %s852_s27  ;;  %s148_s3 = scalar_lea.vmem [#allocation3], %s834_s26 }
  0x18   : > { %s158_s4 = sshll.u32 %s148_s3, 4  ;;  %p1412_p0 = pnand %p973_p13, %p1375_p4  ;;  %s1408_s4 = int_to_ptr.vmem [resolvable:$true] %s158_s4 }
  0x19   : > { %s145_s6 = scalar_lea.sflag [#allocation4], %s1399_s25  ;;  %s1161_s7 = scalar_lea.hbm %s1406_s30, 2048 }
  0x1a   : > { %p1162_p2 = scmp.ne.s32.totalorder %s1406_s30, %s1161_s7  ;;  %p1163_p3 = pneg %p1412_p0 }
  0x1b   : > { %s1166_s16 = scalar_lea.hbm %s1921_s0, 4096  ;;  %p1167_p4 = scmp.lt.u32.totalorder %s1406_s30, %s1921_s0 }
  0x1c   : > { %p1164_p5 = pnand %p1163_p3, %p1162_p2  ;;  %p1168_p7 = scmp.lt.u32.totalorder %s1166_s16, %s1161_s7 }
  0x1d   : > { %p1170_p13 = scmp.lt.u32.totalorder %s1161_s7, %s1406_s30 }
  0x1e   : > { %p1165_p6 = pneg %p1164_p5  ;;  %p1169_p10 = por %p1168_p7, %p1167_p4 }
  0x20   : > { %p1171_p12 = por %p1170_p13, %p1169_p10 }
  0x22   : > { %p1172_p1 = pnand %p1171_p12, %p1165_p6 }
  0x24   : > { %1175 = shalt.err (!%p1172_p1)
}
  0x25   : > { %s1176_s20 = scalar_lea.vmem %s1408_s4, 2048  ;;  %s1309_s26 = smov [#allocation3]  }
  0x26   : > { %p1177_p2 = scmp.ne.s32.totalorder %s1408_s4, %s1176_s20  ;;  %s1181_s27 = sshll.u32 %s1309_s26, 4  ;;  %s1182_s27 = int_to_ptr.vmem [resolvable:$false] %s1181_s27 }
  0x27   : > { %s1183_s28 = scalar_lea.vmem %s1182_s27, 4096  ;;  %p1184_p9 = scmp.lt.s32.totalorder %s1408_s4, %s1182_s27 }
  0x28   : > { %p1179_p5 = pnand %p1177_p2, %p1163_p3  ;;  %p1185_p4 = scmp.lt.s32.totalorder %s1183_s28, %s1176_s20 }
  0x2a   : > { %p1180_p11 = pneg %p1179_p5  ;;  %p1186_p7 = por %p1185_p4, %p1184_p9 }
  0x2c   : > { %p1187_p10 = pnand %p1186_p7, %p1180_p11 }
  0x2e   : > { %1190 = shalt.err (!%p1187_p10)
}
  0x2f   : > { %s1310_s29 = smov 64   ;;  %s1311_s3 = smov 4  }
  0x30   : > { %965 = dma.hbm_to_vmem [thread:$0]  (!%p1412_p0), %s1406_s30, 2048, %s1408_s4, %s145_s6, %s1310_s29, %s1310_s29, %s1311_s3  }
  0x31   : > { %p189_p12 = scmp.lt.s32.totalorder %s1307_s14, 3  ;;  %s837_s7 = sshll.u32 %s1399_s25, 4 }
  0x32   : > { %s853_s8 = sshll.u32 %s1303_s13, 8  ;;  %p1946_p9 = scmp.ge.s32.totalorder %s1307_s14, 1 }
  0x33   : > { %s1457_s19 = scalar_lea.hbm %s1922_s1, %s853_s8  ;;  %s172_s20 = scalar_lea.vmem [#allocation6], %s837_s7 }
  0x34   : > { %p1450_p11 = pnand %p1946_p9, %p189_p12  ;;  %s181_s26 = sshll.u32 %s172_s20, 4  ;;  %s1459_s26 = int_to_ptr.vmem [resolvable:$true] %s181_s26 }
  0x35   : > { %s169_s30 = scalar_lea.sflag [#allocation7], %s1399_s25  ;;  %s1191_s4 = scalar_lea.hbm %s1457_s19, 256 }
  0x36   : > { %p1192_p1 = scmp.ne.s32.totalorder %s1457_s19, %s1191_s4  ;;  %s1196_s28 = scalar_lea.hbm %s1922_s1, 512 }
  0x37   : > { %p1197_p2 = scmp.lt.u32.totalorder %s1457_s19, %s1922_s1  ;;  %p1198_p5 = scmp.lt.u32.totalorder %s1196_s28, %s1191_s4 }
  0x38   : > { %p1194_p6 = pnand %p1192_p1, %p1163_p3  ;;  %p1200_p7 = scmp.lt.u32.totalorder %s1191_s4, %s1457_s19 }
  0x39   : > { %p1199_p4 = por %p1198_p5, %p1197_p2 }
  0x3a   : > { %p1195_p13 = pneg %p1194_p6 }
  0x3b   : > { %p1201_p10 = por %p1200_p7, %p1199_p4 }
  0x3d   : > { %p1202_p12 = pnand %p1201_p10, %p1195_p13 }
  0x3f   : > { %1205 = shalt.err (!%p1202_p12)
}
  0x40   : > { %s1206_s7 = scalar_lea.vmem %s1459_s26, 256  ;;  %s1312_s8 = smov [#allocation6]  }
  0x41   : > { %p1207_p9 = scmp.ne.s32.totalorder %s1459_s26, %s1206_s7  ;;  %s1211_s16 = sshll.u32 %s1312_s8, 4  ;;  %s1212_s16 = int_to_ptr.vmem [resolvable:$false] %s1211_s16 }
  0x42   : > { %s1213_s18 = scalar_lea.vmem %s1212_s16, 512  ;;  %p1214_p8 = scmp.lt.s32.totalorder %s1459_s26, %s1212_s16 }
  0x43   : > { %p1209_p1 = pnand %p1207_p9, %p1163_p3  ;;  %p1215_p2 = scmp.lt.s32.totalorder %s1213_s18, %s1206_s7 }
  0x45   : > { %p1210_p6 = pneg %p1209_p1  ;;  %p1216_p5 = por %p1215_p2, %p1214_p8 }
  0x47   : > { %p1217_p4 = pnand %p1216_p5, %p1210_p6 }
  0x49   : > { %1220 = shalt.err (!%p1217_p4)
}
  0x4a   : > { %s1313_s20 = smov 128   ;;  %s1314_s4 = smov 8  }
  0x4b   : > { %968 = dma.hbm_to_vmem [thread:$0]  (!%p1412_p0), %s1457_s19, 256, %s1459_s26, %s169_s30, %s1313_s20, %s1313_s20, %s1314_s4  }
  0x4c   : > { %193 = sbr.rel (%p1450_p11) target bundleno = 424 (0x1a8), region = 28  ;;  %s1490_s6 = sand.u32 (!%p1450_p11), 1, %s1291_s10  }
  0x4d   : > { %s841_s27 = sshll.u32 (!%p1450_p11), %s1490_s6, 7  ;;  %s196_s28 = scalar_lea.sflag (!%p1450_p11), [#allocation4], %s1490_s6 }
  0x4e   : > { %s1494_s29 = scalar_lea.vmem (!%p1450_p11), [#allocation3], %s841_s27  ;;  %p1948_p8 = scmp.ne.s32.totalorder (!%p1450_p11), %s1942_s21, 0 }
  0x53   : > { %1274 = dma.done.wait (%p1948_p8), %s196_s28, 2048  }
  0x54   : > { %1276 = vsyncadd (%p1948_p8), %s196_s28, 4294965248  ;;  %s842_s25 = sshll.u32 %s1490_s6, 4  ;;  %s205_s5 = scalar_lea.sflag [#allocation7], %s1490_s6 }
  0x55   : > { %s1504_s15 = scalar_lea.vmem [#allocation6], %s842_s25 }
  0x56   : > { %1278 = dma.done.wait (%p1948_p8), %s205_s5, 256  }
  0x57   : > { %1280 = vsyncadd (%p1948_p8), %s205_s5, 4294967040  ;;  %v1315_v0 = vmov 0.0   ;;  %v926_v1 = vld [vmem:[%s1494_s29 + $0x40] sm:$0xff]   ;;  %v1513_v7 = vld [vmem:[%s1494_s29 + $0x8] sm:$0xff]   ;;  %s854_s21 = sshll.u32 %s1299_s12, 8  ;;  %s233_s19 = scalar_lea.vmem [#allocation8], %s842_s25 }
  0x58   : > { %243 = vst [vmem:[#allocation2] sm:$0x1] %v1315_v0  ;;  %v889_v2 = vunpack.c.l.bf16 %v926_v1  ;;  %v890_v3 = vunpack.c.h.bf16 %v926_v1  ;;  %v856_v4 = vld [vmem:[%s1494_s29] sm:$0xff]   ;;  %v1516_v8 = vld [vmem:[%s1494_s29 + $0x10] sm:$0xff]   ;;  %v1519_v10 = vld [vmem:[%s1494_s29 + $0x18] sm:$0xff]   ;;  %v861_v14 = vunpack.c.l.bf16 %v1513_v7  ;;  %v862_v15 = vunpack.c.h.bf16 %v1513_v7  ;;  %s714_s26 = sshll.u32 %s233_s19, 4  ;;  %s1870_s7 = scalar_lea.hbm %s1923_s2, %s854_s21  ;;  %s1872_s26 = int_to_ptr.vmem [resolvable:$true] %s714_s26 }
  0x59   : > { %v857_v9 = vunpack.c.l.bf16 %v856_v4  ;;  %v858_v11 = vunpack.c.h.bf16 %v856_v4  ;;  %v1522_v12 = vld [vmem:[%s1494_s29 + $0x20] sm:$0xff]   ;;  %v1525_v13 = vld [vmem:[%s1494_s29 + $0x28] sm:$0xff]   ;;  %v865_v16 = vunpack.c.l.bf16 %v1516_v8  ;;  %v1531_v17 = vld [vmem:[%s1494_s29 + $0x30] sm:$0xff]   ;;  %v866_v19 = vunpack.c.h.bf16 %v1516_v8  ;;  %s700_s8 = scalar_lea.sflag [#allocation5], %s1490_s6  ;;  %s1221_s12 = scalar_lea.vmem %s1872_s26, 256 }
  0x5a   : > { %1033 = vlog2.f32 %v889_v2  ;;  %v420_v5 = vsub.f32 1.0, %v889_v2  ;;  %v421_v6 = vsub.f32 1.0, %v890_v3  ;;  %v1032_v18 = vld [vmem:[%s1504_s15 + $0x4] ss:$8 sps:$4 sm:$0xff]   ;;  %v869_v20 = vunpack.c.l.bf16 %v1519_v10  ;;  %p1222_p0 = scmp.ne.s32.totalorder %s1872_s26, %s1221_s12  ;;  %p1966_p3 = scmp.ne.s32.totalorder %s1943_s22, 0 }
  0x5b   : > { %1035 = vlog2.f32 %v890_v3  ;;  %v870_v21 = vunpack.c.h.bf16 %v1519_v10  ;;  %v1538_v22 = vld [vmem:[%s1494_s29 + $0x38] sm:$0xff]   ;;  %v1938_v23 = vunpack.c.l.bf16 %v1522_v12  ;;  %v1937_v24 = vunpack.c.h.bf16 %v1522_v12  ;;  %v1543_v25 = vld [vmem:[%s1494_s29 + $0x48] sm:$0xff]   ;;  %626 = vmatprep.mubr.bf16.mxu0 %v1032_v18  ;;  %v1581_v54 = vld [vmem:[%s1494_s29 + $0x50] sm:$0xff]   ;;  %s1316_s16 = smov [#allocation8]  }
  0x5c   : > { %1037 = vlog2.f32 %v420_v5  ;;  %v404_v26 = vsub.f32 1.0, %v857_v9  ;;  %v1931_v27 = vunpack.c.l.bf16 %v1525_v13  ;;  %v1930_v28 = vunpack.c.h.bf16 %v1525_v13  ;;  %v1588_v59 = vld [vmem:[%s1494_s29 + $0x58] sm:$0xff]   ;;  %v1597_v4 = vld [vmem:[%s1494_s29 + $0x60] sm:$0xff]   ;;  %p1223_p11 = pnand %p1222_p0, %p1966_p3  ;;  %s1225_s18 = sshll.u32 %s1316_s16, 4  ;;  %s1226_s18 = int_to_ptr.vmem [resolvable:$false] %s1225_s18 }
  0x5d   : > { %1039 = vlog2.f32 %v421_v6  ;;  %v1929_v29 = vunpack.c.l.bf16 %v1531_v17  ;;  %v405_v30 = vsub.f32 1.0, %v858_v11  ;;  %v1928_v31 = vunpack.c.h.bf16 %v1531_v17  ;;  %s1227_s20 = scalar_lea.vmem %s1226_s18, 512  ;;  %p1228_p7 = scmp.lt.s32.totalorder %s1872_s26, %s1226_s18 }
  0x5e   : > { %1041 = vlog2.f32 %v857_v9  ;;  %v1927_v32 = vunpack.c.l.bf16 %v1538_v22  ;;  %v1926_v33 = vunpack.c.h.bf16 %v1538_v22  ;;  %v406_v34 = vsub.f32 1.0, %v861_v14  ;;  %p1224_p13 = pneg %p1223_p11  ;;  %p1229_p10 = scmp.lt.s32.totalorder %s1227_s20, %s1221_s12 }
  0x5f   : > { %1043 = vlog2.f32 %v858_v11  ;;  %v893_v35 = vunpack.c.l.bf16 %v1543_v25  ;;  %v407_v36 = vsub.f32 1.0, %v862_v15  ;;  %v408_v37 = vsub.f32 1.0, %v865_v16 }
  0x60   : > { %v409_v38 = vsub.f32 1.0, %v866_v19  ;;  %v410_v39 = vsub.f32 1.0, %v869_v20  ;;  %v411_v40 = vsub.f32 1.0, %v870_v21  ;;  %v412_v41 = vsub.f32 1.0, %v1938_v23  ;;  %p1230_p12 = por %p1229_p10, %p1228_p7 }
  0x61   : > { %1045 = vlog2.f32 %v404_v26  ;;  %v413_v43 = vsub.f32 1.0, %v1937_v24  ;;  %v414_v44 = vsub.f32 1.0, %v1931_v27  ;;  %v415_v45 = vsub.f32 1.0, %v1930_v28 }
  0x62   : > { %1047 = vlog2.f32 %v405_v30  ;;  %v416_v48 = vsub.f32 1.0, %v1929_v29  ;;  %v417_v49 = vsub.f32 1.0, %v1928_v31  ;;  %v418_v52 = vsub.f32 1.0, %v1927_v32  ;;  %p1231_p9 = pnand %p1230_p12, %p1224_p13 }
  0x63   : > { %1049 = vlog2.f32 %v406_v34  ;;  %v419_v53 = vsub.f32 1.0, %v1926_v33  ;;  %v422_v58 = vsub.f32 1.0, %v893_v35  ;;  %v894_v63 = vunpack.c.h.bf16 %v1543_v25 }
  0x64   : > { %v1034_v42 = vpop.eup %1033  ;;  %1051 = vlog2.f32 %v407_v36  ;;  %v897_v2 = vunpack.c.l.bf16 %v1581_v54  ;;  %v898_v3 = vunpack.c.h.bf16 %v1581_v54  ;;  %v901_v9 = vunpack.c.l.bf16 %v1588_v59 }
  0x65   : > { %v1036_v46 = vpop.eup %1035  ;;  %v341_v47 = vmul.f32 0.6931472, %v1034_v42  ;;  %1053 = vlog2.f32 %v408_v37  ;;  %v902_v26 = vunpack.c.h.bf16 %v1588_v59  ;;  %v423_v34 = vsub.f32 1.0, %v894_v63  ;;  %v1610_v37 = vld [vmem:[%s1494_s29 + $0x68] sm:$0xff]  }
  0x66   : > { %v1038_v50 = vpop.eup %1037  ;;  %v343_v51 = vmul.f32 0.6931472, %v1036_v46  ;;  %1055 = vlog2.f32 %v409_v38  ;;  %v905_v36 = vunpack.c.l.bf16 %v1597_v4 }
  0x67   : > { %v1040_v55 = vpop.eup %1039  ;;  %v388_v56 = vmax.f32 %v341_v47, -100.0  ;;  %v1583_v57 = vmul.f32 0.6931472, %v1038_v50  ;;  %1057 = vlog2.f32 %v410_v39  ;;  %v1614_v39 = vsub.f32 1.0, %v897_v2 }
  0x68   : > { %v1042_v60 = vpop.eup %1041  ;;  %v389_v61 = vmax.f32 %v343_v51, -100.0  ;;  %v1590_v62 = vmul.f32 0.6931472, %v1040_v55  ;;  %1059 = vlog2.f32 %v411_v40  ;;  %v1618_v40 = vsub.f32 1.0, %v898_v3 }
  0x69   : > { %v1044_v0 = vpop.eup %1043  ;;  %v1934_v1 = vmax.f32 %v1583_v57, -100.0  ;;  %v309_v6 = vmul.f32 0.6931472, %v1042_v60  ;;  %1061 = vlog2.f32 %v412_v41  ;;  %v906_v41 = vunpack.c.h.bf16 %v1597_v4 }
  0x6a   : > { %v1932_v5 = vmax.f32 %v1590_v62, -100.0  ;;  %v311_v18 = vmul.f32 0.6931472, %v1044_v0  ;;  %1063 = vlog2.f32 %v413_v43  ;;  %v1626_v0 = vsub.f32 1.0, %v901_v9 }
  0x6b   : > { %v548_v11 = vsub.f32 %v388_v56, %v1934_v1  ;;  %v1046_v38 = vpop.eup %1045  ;;  %1065 = vlog2.f32 %v414_v44  ;;  %v372_v46 = vmax.f32 %v309_v6, -100.0  ;;  %v1935_v44 = vunpack.c.l.bf16 %v1610_v37 }
  0x6c   : > { %v549_v30 = vsub.f32 %v389_v61, %v1932_v5  ;;  %v1048_v42 = vpop.eup %1047  ;;  %v437_v47 = vmul.f32 0.6931472, %v1046_v38  ;;  %1067 = vlog2.f32 %v415_v45  ;;  %v373_v51 = vmax.f32 %v311_v18, -100.0 }
  0x6d   : > { %v1050_v50 = vpop.eup %1049  ;;  %v439_v55 = vmul.f32 0.6931472, %v1048_v42  ;;  %1069 = vlog2.f32 %v416_v48  ;;  %v1634_v48 = vsub.f32 1.0, %v905_v36  ;;  %v1640_v38 = vsub.f32 1.0, %v906_v41  ;;  %v1643_v42 = vld [vmem:[%s1494_s29 + $0x70] sm:$0xff]  }
  0x6e   : > { %v572_v43 = vpack.c.bf16 %v549_v30, %v548_v11  ;;  %v1052_v56 = vpop.eup %1051  ;;  %v1622_v60 = vmul.f32 0.6931472, %v1050_v50  ;;  %1071 = vlog2.f32 %v417_v49  ;;  %v500_v61 = vmax.f32 %v437_v47, -100.0 }
  0x6f   : > { %v1054_v6 = vpop.eup %1053  ;;  %1073 = vlog2.f32 %v418_v52  ;;  %v501_v45 = vmax.f32 %v439_v55, -100.0  ;;  %v1630_v11 = vsub.f32 1.0, %v902_v26  ;;  %v1636_v30 = vmul.f32 0.6931472, %v1052_v56 }
  0x70   : > { %934 = vmatprep.subr.bf16.mxu0 %v572_v43  ;;  %v1056_v18 = vpop.eup %1055  ;;  %1075 = vlog2.f32 %v419_v53  ;;  %v532_v49 = vsub.f32 %v372_v46, %v500_v61  ;;  %v1933_v47 = vunpack.c.h.bf16 %v1610_v37  ;;  %v1648_v50 = vsub.f32 1.0, %v1935_v44 }
  0x71   : > { %v1058_v52 = vpop.eup %1057  ;;  %1077 = vlog2.f32 %v422_v58  ;;  %v533_v43 = vsub.f32 %v373_v51, %v501_v45  ;;  %v1650_v56 = vmul.f32 0.6931472, %v1054_v6  ;;  %v502_v53 = vmax.f32 %v1622_v60, -100.0 }
  0x72   : > { %v1060_v55 = vpop.eup %1059  ;;  %v640_v46 = vadd.f32 %v501_v45, %v500_v61  ;;  %1079 = vlog2.f32 %v893_v35  ;;  %v1655_v32 = vmul.f32 0.6931472, %v1056_v18  ;;  %v1660_v29 = vmul.f32 0.6931472, %v1058_v52 }
  0x73   : > { %v1062_v33 = vpop.eup %1061  ;;  %v564_v58 = vpack.c.bf16 %v533_v43, %v532_v49  ;;  %1081 = vlog2.f32 %v894_v63  ;;  %v503_v6 = vmax.f32 %v1636_v30, -100.0  ;;  %v1665_v35 = vmul.f32 0.6931472, %v1060_v55 }
  0x74   : > { %v1064_v31 = vpop.eup %1063  ;;  %v641_v61 = vadd.f32 %v640_v46, %v502_v53  ;;  %1083 = vlog2.f32 %v423_v34  ;;  %v1667_v18 = vmul.f32 0.6931472, %v1062_v33  ;;  %v1673_v25 = vsub.f32 1.0, %v1933_v47 }
  0x75   : > { %v1066_v45 = vpop.eup %1065  ;;  %935 = vmatpush3.bf16.msra.mxu0 %v564_v58  ;;  %1085 = vlog2.f32 %v861_v14  ;;  %v1675_v49 = vmul.f32 0.6931472, %v1064_v31  ;;  %v504_v52 = vmax.f32 %v1650_v56, -100.0  ;;  %v505_v14 = vmax.f32 %v1655_v32, -100.0 }
  0x76   : > { %v1068_v63 = vpop.eup %1067  ;;  %v642_v34 = vadd.f32 %v641_v61, %v503_v6  ;;  %1087 = vlog2.f32 %v862_v15  ;;  %v1682_v43 = vmul.f32 0.6931472, %v1066_v45  ;;  %v1936_v58 = vmax.f32 %v1660_v29, -100.0 }
  0x77   : > { %v1070_v33 = vpop.eup %1069  ;;  %v1684_v55 = vmul.f32 0.6931472, %v1068_v63  ;;  %1089 = vlog2.f32 %v897_v2  ;;  %v507_v45 = vmax.f32 %v1665_v35, -100.0  ;;  %v1939_v63 = vmax.f32 %v1667_v18, -100.0 }
  0x78   : > { %v1072_v31 = vpop.eup %1071  ;;  %v1689_v46 = vmul.f32 0.6931472, %v1070_v33  ;;  %v643_v61 = vadd.f32 %v642_v34, %v504_v52  ;;  %1091 = vlog2.f32 %v898_v3  ;;  %v509_v28 = vmax.f32 %v1675_v49, -100.0 }
  0x79   : > { %v1074_v7 = vpop.eup %1073  ;;  %v1696_v15 = vmul.f32 0.6931472, %v1072_v31  ;;  %1093 = vlog2.f32 %v1614_v39  ;;  %v1940_v31 = vmax.f32 %v1682_v43, -100.0  ;;  %v511_v27 = vmax.f32 %v1684_v55, -100.0 }
  0x7a   : > { %v1076_v2 = vpop.eup %1075  ;;  %v1701_v33 = vmul.f32 0.6931472, %v1074_v7  ;;  %v644_v34 = vadd.f32 %v643_v61, %v505_v14  ;;  %1095 = vlog2.f32 %v1618_v40  ;;  %v512_v5 = vmax.f32 %v1689_v46, -100.0 }
  0x7b   : > { %v1078_v54 = vpop.eup %1077  ;;  %v1707_v3 = vmul.f32 0.6931472, %v1076_v2  ;;  %1097 = vlog2.f32 %v865_v16  ;;  %v513_v2 = vmax.f32 %v1696_v15, -100.0  ;;  %v1949_v56 = vunpack.c.l.bf16 %v1522_v12 }
  0x7c   : > { %v1080_v39 = vpop.eup %1079  ;;  %v1713_v7 = vmul.f32 0.6931472, %v1078_v54  ;;  %v645_v61 = vadd.f32 %v644_v34, %v1936_v58  ;;  %1099 = vlog2.f32 %v866_v19  ;;  %v514_v51 = vmax.f32 %v1701_v33, -100.0 }
  0x7d   : > { %v1082_v40 = vpop.eup %1081  ;;  %v345_v47 = vmul.f32 0.6931472, %v1080_v39  ;;  %1101 = vlog2.f32 %v901_v9  ;;  %v515_v19 = vmax.f32 %v1707_v3, -100.0  ;;  %v1965_v55 = vunpack.c.h.bf16 %v1538_v22 }
  0x7e   : > { %v1084_v16 = vpop.eup %1083  ;;  %v518_v54 = vmax.f32 %v1713_v7, -100.0  ;;  %v646_v1 = vadd.f32 %v645_v61, %v507_v45  ;;  %v347_v44 = vmul.f32 0.6931472, %v1082_v40  ;;  %1103 = vlog2.f32 %v902_v26  ;;  %v933_v7 = vld [vmem:[%s1494_s29 + $0x78] sm:$0xff]  }
  0x7f   : > { %v1086_v8 = vpop.eup %1085  ;;  %v390_v34 = vmax.f32 %v345_v47, -100.0  ;;  %v1730_v58 = vmul.f32 0.6931472, %v1084_v16  ;;  %1105 = vlog2.f32 %v1626_v0 }
  0x80   : > { %v1088_v39 = vpop.eup %1087  ;;  %v647_v9 = vadd.f32 %v646_v1, %v1939_v63  ;;  %v391_v24 = vmax.f32 %v347_v44, -100.0  ;;  %v313_v23 = vmul.f32 0.6931472, %v1086_v8  ;;  %1107 = vlog2.f32 %v1630_v11 }
  0x81   : > { %v1090_v61 = vpop.eup %1089  ;;  %v519_v59 = vmax.f32 %v1730_v58, -100.0  ;;  %v550_v26 = vsub.f32 %v390_v34, %v518_v54  ;;  %v315_v40 = vmul.f32 0.6931472, %v1088_v39  ;;  %1109 = vlog2.f32 %v869_v20 }
  0x82   : > { %v1092_v47 = vpop.eup %1091  ;;  %v648_v0 = vadd.f32 %v647_v9, %v509_v28  ;;  %v374_v16 = vmax.f32 %v313_v23, -100.0  ;;  %v349_v1 = vmul.f32 0.6931472, %v1090_v61  ;;  %1111 = vlog2.f32 %v870_v21 }
  0x83   : > { %v1094_v44 = vpop.eup %1093  ;;  %v551_v11 = vsub.f32 %v391_v24, %v519_v59  ;;  %v375_v8 = vmax.f32 %v315_v40, -100.0  ;;  %v351_v63 = vmul.f32 0.6931472, %v1092_v47  ;;  %1113 = vlog2.f32 %v905_v36 }
  0x84   : > { %v1096_v34 = vpop.eup %1095  ;;  %v649_v20 = vadd.f32 %v648_v0, %v1940_v31  ;;  %v534_v23 = vsub.f32 %v374_v16, %v502_v53  ;;  %v392_v39 = vmax.f32 %v349_v1, -100.0  ;;  %v1753_v9 = vmul.f32 0.6931472, %v1094_v44 }
  0x85   : > { %v1098_v10 = vpop.eup %1097  ;;  %v573_v21 = vpack.c.bf16 %v551_v11, %v550_v26  ;;  %v535_v24 = vsub.f32 %v375_v8, %v503_v6  ;;  %v393_v61 = vmax.f32 %v351_v63, -100.0  ;;  %v1757_v40 = vmul.f32 0.6931472, %v1096_v34 }
  0x86   : > { %v1100_v47 = vpop.eup %1099  ;;  %v650_v36 = vadd.f32 %v649_v20, %v511_v27  ;;  %v520_v0 = vmax.f32 %v1753_v9, -100.0  ;;  %v317_v31 = vmul.f32 0.6931472, %v1098_v10  ;;  %1115 = vlog2.f32 %v906_v41 }
  0x87   : > { %v1102_v60 = vpop.eup %1101  ;;  %936 = vmatprep.subr.bf16.mxu0 %v573_v21  ;;  %v565_v53 = vpack.c.bf16 %v535_v24, %v534_v23  ;;  %v521_v26 = vmax.f32 %v1757_v40, -100.0  ;;  %v319_v30 = vmul.f32 0.6931472, %v1100_v47  ;;  %1117 = vlog2.f32 %v1634_v48 }
  0x88   : > { %v1104_v6 = vpop.eup %1103  ;;  %v651_v63 = vadd.f32 %v650_v36, %v512_v5  ;;  %v552_v16 = vsub.f32 %v392_v39, %v520_v0  ;;  %v376_v1 = vmax.f32 %v317_v31, -100.0  ;;  %v353_v44 = vmul.f32 0.6931472, %v1102_v60 }
  0x89   : > { %v1106_v11 = vpop.eup %1105  ;;  %937 = vmatpush3.bf16.msra.mxu0 %v565_v53  ;;  %v553_v4 = vsub.f32 %v393_v61, %v521_v26  ;;  %v377_v41 = vmax.f32 %v319_v30, -100.0  ;;  %v355_v8 = vmul.f32 0.6931472, %v1104_v6  ;;  %1119 = vlog2.f32 %v1640_v38 }
  0x8a   : > { %v1108_v34 = vpop.eup %1107  ;;  %v652_v48 = vadd.f32 %v651_v63, %v513_v2  ;;  %v536_v20 = vsub.f32 %v376_v1, %v504_v52  ;;  %v394_v23 = vmax.f32 %v353_v44, -100.0  ;;  %v1777_v39 = vmul.f32 0.6931472, %v1106_v11 }
  0x8b   : > { %v1110_v31 = vpop.eup %1109  ;;  %v574_v10 = vpack.c.bf16 %v553_v4, %v552_v16  ;;  %v537_v21 = vsub.f32 %v377_v41, %v505_v14  ;;  %v395_v24 = vmax.f32 %v355_v8, -100.0  ;;  %v1781_v61 = vmul.f32 0.6931472, %v1108_v34 }
  0x8c   : > { %v1112_v47 = vpop.eup %1111  ;;  %v653_v38 = vadd.f32 %v652_v48, %v514_v51  ;;  %v522_v36 = vmax.f32 %v1777_v39, -100.0  ;;  %v321_v60 = vmul.f32 0.6931472, %v1110_v31  ;;  %1121 = vlog2.f32 %v1949_v56 }
  0x8d   : > { %v1114_v52 = vpop.eup %1113  ;;  %938 = vmatprep.subr.bf16.mxu0 %v574_v10  ;;  %v566_v53 = vpack.c.bf16 %v537_v21, %v536_v20  ;;  %v523_v30 = vmax.f32 %v1781_v61, -100.0  ;;  %v323_v32 = vmul.f32 0.6931472, %v1112_v47  ;;  %v1950_v14 = vunpack.c.h.bf16 %v1522_v12 }
  0x8e   : > { %v654_v6 = vadd.f32 %v653_v38, %v515_v19  ;;  %v554_v63 = vsub.f32 %v394_v23, %v522_v36  ;;  %v378_v16 = vmax.f32 %v321_v60, -100.0  ;;  %v357_v1 = vmul.f32 0.6931472, %v1114_v52 }
  0x8f   : > { %1123 = vlog2.f32 %v1950_v14  ;;  %939 = vmatpush3.bf16.msra.mxu0 %v566_v53  ;;  %v555_v44 = vsub.f32 %v395_v24, %v523_v30  ;;  %v379_v11 = vmax.f32 %v323_v32, -100.0  ;;  %v1951_v4 = vunpack.c.l.bf16 %v1610_v37 }
  0x90   : > { %v914_v41 = vunpack.c.h.bf16 %v1643_v42  ;;  %v1116_v12 = vpop.eup %1115  ;;  %v1952_v8 = vmax.f32 %v1583_v57, -100.0  ;;  %v1953_v48 = vmax.f32 %v1660_v29, -100.0  ;;  %v1954_v23 = vunpack.c.h.bf16 %v1610_v37 }
  0x91   : > { %1125 = vlog2.f32 %v1951_v4  ;;  %v1955_v31 = vunpack.c.l.bf16 %v1643_v42  ;;  %v1118_v21 = vpop.eup %1117  ;;  %v575_v24 = vpack.c.bf16 %v555_v44, %v554_v63  ;;  %v539_v47 = vsub.f32 %v379_v11, %v507_v45 }
  0x92   : > { %v655_v34 = vadd.f32 %v654_v6, %v1952_v8  ;;  %v538_v20 = vsub.f32 %v378_v16, %v1953_v48  ;;  %1127 = vlog2.f32 %v1954_v23  ;;  %v359_v38 = vmul.f32 0.6931472, %v1116_v12 }
  0x93   : > { %v432_v10 = vsub.f32 1.0, %v1955_v31  ;;  %1129 = vlog2.f32 %v1648_v50  ;;  %v1956_v57 = vmax.f32 %v1590_v62, -100.0  ;;  %v396_v56 = vmax.f32 %v357_v1, -100.0  ;;  %v1120_v37 = vpop.eup %1119  ;;  %940 = vmatprep.subr.bf16.mxu0 %v575_v24 }
  0x94   : > { %v1813_v29 = vmul.f32 0.6931472, %v1118_v21  ;;  %1131 = vlog2.f32 %v1673_v25  ;;  %v567_v52 = vpack.c.bf16 %v539_v47, %v538_v20  ;;  %v397_v53 = vmax.f32 %v359_v38, -100.0 }
  0x95   : > { %v656_v60 = vadd.f32 %v655_v34, %v1956_v57  ;;  %v1957_v32 = vunpack.c.l.bf16 %v1525_v13  ;;  %v433_v35 = vsub.f32 1.0, %v914_v41  ;;  %v1820_v45 = vmul.f32 0.6931472, %v1120_v37 }
  0x96   : > { %v524_v62 = vmax.f32 %v1813_v29, -100.0  ;;  %v1958_v14 = vunpack.c.h.bf16 %v1525_v13  ;;  %941 = vmatpush3.bf16.msra.mxu0 %v567_v52  ;;  %v1959_v25 = vmov %v1955_v31  ;;  %v1122_v6 = vpop.eup %1121  ;;  %v1960_v8 = vunpack.c.l.bf16 %v1531_v17 }
  0x97   : > { %1133 = vlog2.f32 %v1957_v32  ;;  %v657_v50 = vadd.f32 %v656_v60, %v518_v54  ;;  %v525_v16 = vmax.f32 %v1820_v45, -100.0  ;;  %v325_v44 = vmul.f32 0.6931472, %v1122_v6 }
  0x98   : > { %1135 = vlog2.f32 %v1958_v14  ;;  %v556_v1 = vsub.f32 %v396_v56, %v524_v62  ;;  %v917_v58 = vunpack.c.l.bf16 %v933_v7  ;;  %v1961_v9 = vmax.f32 %v1667_v18, -100.0 }
  0x99   : > { %1137 = vlog2.f32 %v1959_v25  ;;  %v658_v63 = vadd.f32 %v657_v50, %v519_v59  ;;  %v1124_v54 = vpop.eup %1123  ;;  %v557_v11 = vsub.f32 %v397_v53, %v525_v16  ;;  %v380_v12 = vmax.f32 %v325_v44, -100.0 }
  0x9a   : > { %1139 = vlog2.f32 %v914_v41  ;;  %v327_v4 = vmul.f32 0.6931472, %v1124_v54  ;;  %v918_v21 = vunpack.c.h.bf16 %v933_v7  ;;  %v434_v18 = vsub.f32 1.0, %v917_v58 }
  0x9b   : > { %1141 = vlog2.f32 %v432_v10  ;;  %v659_v13 = vadd.f32 %v658_v63, %v520_v0  ;;  %v1126_v42 = vpop.eup %1125  ;;  %v576_v34 = vpack.c.bf16 %v557_v11, %v556_v1  ;;  %v540_v0 = vsub.f32 %v380_v12, %v1961_v9 }
  0x9c   : > { %1143 = vlog2.f32 %v433_v35  ;;  %v1128_v59 = vpop.eup %1127  ;;  %v381_v48 = vmax.f32 %v327_v4, -100.0  ;;  %v361_v20 = vmul.f32 0.6931472, %v1126_v42  ;;  %v1962_v10 = vunpack.c.h.bf16 %v1531_v17 }
  0x9d   : > { %1145 = vlog2.f32 %v1960_v8  ;;  %v660_v41 = vadd.f32 %v659_v13, %v521_v26  ;;  %v1130_v23 = vpop.eup %1129  ;;  %v363_v31 = vmul.f32 0.6931472, %v1128_v59  ;;  %942 = vmatprep.subr.bf16.mxu0 %v576_v34  ;;  %v435_v49 = vsub.f32 1.0, %v918_v21 }
  0x9e   : > { %1147 = vlog2.f32 %v1962_v10  ;;  %v1132_v24 = vpop.eup %1131  ;;  %v541_v40 = vsub.f32 %v381_v48, %v509_v28  ;;  %v398_v26 = vmax.f32 %v361_v20, -100.0  ;;  %v489_v38 = vmul.f32 0.6931472, %v1130_v23 }
  0x9f   : > { %v661_v47 = vadd.f32 %v660_v41, %v522_v36  ;;  %v399_v60 = vmax.f32 %v363_v31, -100.0  ;;  %v491_v56 = vmul.f32 0.6931472, %v1132_v24  ;;  %1149 = vlog2.f32 %v917_v58 }
  0xa0   : > { %v568_v37 = vpack.c.bf16 %v541_v40, %v540_v0  ;;  %v526_v52 = vmax.f32 %v489_v38, -100.0  ;;  %1151 = vlog2.f32 %v918_v21  ;;  %v1963_v7 = vmax.f32 %v1682_v43, -100.0 }
  0xa1   : > { %v1134_v57 = vpop.eup %1133  ;;  %v662_v17 = vadd.f32 %v661_v47, %v523_v30  ;;  %v527_v36 = vmax.f32 %v491_v56, -100.0  ;;  %1153 = vlog2.f32 %v434_v18  ;;  %v1964_v43 = vunpack.c.l.bf16 %v1538_v22 }
  0xa2   : > { %v1136_v29 = vpop.eup %1135  ;;  %v329_v53 = vmul.f32 0.6931472, %v1134_v57  ;;  %943 = vmatpush3.bf16.msra.mxu0 %v568_v37  ;;  %v558_v50 = vsub.f32 %v398_v26, %v526_v52  ;;  %1155 = vlog2.f32 %v435_v49 }
  0xa3   : > { %v1138_v39 = vpop.eup %1137  ;;  %v331_v32 = vmul.f32 0.6931472, %v1136_v29  ;;  %v663_v35 = vadd.f32 %v662_v17, %v524_v62  ;;  %v559_v6 = vsub.f32 %v399_v60, %v527_v36  ;;  %1157 = vlog2.f32 %v1964_v43 }
  0xa4   : > { %v1140_v28 = vpop.eup %1139  ;;  %v382_v45 = vmax.f32 %v329_v53, -100.0  ;;  %v365_v14 = vmul.f32 0.6931472, %v1138_v39  ;;  %1159 = vlog2.f32 %v1965_v55 }
  0xa5   : > { %v1142_v25 = vpop.eup %1141  ;;  %v383_v63 = vmax.f32 %v331_v32, -100.0  ;;  %v367_v1 = vmul.f32 0.6931472, %v1140_v28  ;;  %v664_v30 = vadd.f32 %v663_v35, %v525_v16  ;;  %v577_v4 = vpack.c.bf16 %v559_v6, %v558_v50 }
  0xa6   : > { %v1144_v61 = vpop.eup %1143  ;;  %v542_v54 = vsub.f32 %v382_v45, %v1963_v7  ;;  %v400_v44 = vmax.f32 %v365_v14, -100.0  ;;  %v493_v13 = vmul.f32 0.6931472, %v1142_v25 }
  0xa7   : > { %v1146_v11 = vpop.eup %1145  ;;  %v543_v62 = vsub.f32 %v383_v63, %v511_v27  ;;  %v401_v42 = vmax.f32 %v367_v1, -100.0  ;;  %v495_v12 = vmul.f32 0.6931472, %v1144_v61  ;;  %v665_v8 = vadd.f32 %v664_v30, %v526_v52  ;;  %944 = vmatprep.subr.bf16.mxu0 %v577_v4  ;;  %v1030_v61 = vld [vmem:[%s1504_s15] ss:$8 sps:$4 sm:$0xff]  }
  0xa8   : > { %v528_v58 = vmax.f32 %v493_v13, -100.0  ;;  %v333_v59 = vmul.f32 0.6931472, %v1146_v11  ;;  %v1148_v41 = vpop.eup %1147 }
  0xa9   : > { %v569_v34 = vpack.c.bf16 %v543_v62, %v542_v54  ;;  %v529_v16 = vmax.f32 %v495_v12, -100.0  ;;  %v666_v48 = vadd.f32 %v665_v8, %v527_v36  ;;  %v335_v23 = vmul.f32 0.6931472, %v1148_v41  ;;  %v1150_v0 = vpop.eup %1149  ;;  %v639_v54 = vld [vmem:[#allocation2] sm:$0x1] }
  0xaa   : > { %v560_v20 = vsub.f32 %v400_v44, %v528_v58  ;;  %v384_v9 = vmax.f32 %v333_v59, -100.0  ;;  %v1152_v24 = vpop.eup %1151  ;;  %v369_v40 = vmul.f32 0.6931472, %v1150_v0 }
  0xab   : > { %945 = vmatpush3.bf16.msra.mxu0 %v569_v34  ;;  %v561_v27 = vsub.f32 %v401_v42, %v529_v16  ;;  %v667_v31 = vadd.f32 %v666_v48, %v528_v58  ;;  %v385_v10 = vmax.f32 %v335_v23, -100.0  ;;  %v1154_v38 = vpop.eup %1153  ;;  %v371_v57 = vmul.f32 0.6931472, %v1152_v24 }
  0xac   : > { %v544_v21 = vsub.f32 %v384_v9, %v512_v5  ;;  %v497_v18 = vmul.f32 0.6931472, %v1154_v38  ;;  %v402_v29 = vmax.f32 %v369_v40, -100.0  ;;  %v1156_v22 = vpop.eup %1155 }
  0xad   : > { %v578_v47 = vpack.c.bf16 %v561_v27, %v560_v20  ;;  %v545_v26 = vsub.f32 %v385_v10, %v513_v2  ;;  %v668_v60 = vadd.f32 %v667_v31, %v529_v16  ;;  %v1158_v37 = vpop.eup %1157  ;;  %v403_v52 = vmax.f32 %v371_v57, -100.0 }
  0xae   : > { %v530_v17 = vmax.f32 %v497_v18, -100.0  ;;  %v499_v46 = vmul.f32 0.6931472, %v1156_v22  ;;  %v337_v53 = vmul.f32 0.6931472, %v1158_v37  ;;  %v1160_v39 = vpop.eup %1159 }
  0xaf   : > { %946 = vmatprep.subr.bf16.mxu0 %v578_v47  ;;  %v570_v56 = vpack.c.bf16 %v545_v26, %v544_v21  ;;  %v339_v2 = vmul.f32 0.6931472, %v1160_v39 }
  0xb0   : > { %v669_v5 = vadd.f32 %v668_v60, %v530_v17  ;;  %v531_v36 = vmax.f32 %v499_v46, -100.0  ;;  %v562_v15 = vsub.f32 %v402_v29, %v530_v17  ;;  %v386_v32 = vmax.f32 %v337_v53, -100.0 }
  0xb1   : > { %947 = vmatpush3.bf16.msra.mxu0 %v570_v56  ;;  %v387_v35 = vmax.f32 %v339_v2, -100.0 }
  0xb2   : > { %v563_v49 = vsub.f32 %v403_v52, %v531_v36  ;;  %v670_v28 = vadd.f32 %v669_v5, %v531_v36  ;;  %v546_v50 = vsub.f32 %v386_v32, %v514_v51 }
  0xb3   : > { %v547_v25 = vsub.f32 %v387_v35, %v515_v19 }
  0xb4   : > { %v579_v45 = vpack.c.bf16 %v563_v49, %v562_v15  ;;  %v671_v14 = vrot.slane %v670_v28, 4 }
  0xb5   : > { %v571_v63 = vpack.c.bf16 %v547_v25, %v546_v50 }
  0xb6   : > { %948 = vmatprep.subr.bf16.mxu0 %v579_v45  ;;  %v672_v6 = vadd.f32 %v671_v14, %v670_v28 }
  0xb7   : > { %949 = vmatpush3.bf16.msra.mxu0 %v571_v63 }
  0xb8   : > { %v673_v1 = vrot.slane %v672_v6, 2 }
  0xba   : > { %v674_v30 = vadd.f32 %v673_v1, %v672_v6  ;;  %627 = vmatmul.mubr.bf16.vlgmr.msra.gmra.mrb[0].mxu0 %v1030_v61 }
  0xbc   : > { %v675_v7 = vrot.slane %v674_v30, 1 }
  0xbe   : > { %v676_v44 = vadd.f32 %v675_v7, %v674_v30 }
  0xc0   : > { %v677_v33 = vadd.f32 %v676_v44, %v639_v54 }
  0xc2   : > { %678 = vst [vmem:[#allocation2] sm:$0x1] %v677_v33 }
  0xc9   : > { %v846_v4 = vld [vmem:[#allocation2] ss:$0 sm:$0xff] }
 0x18d   : > { %v950_v51 = vpop.f32.mrb[0].mxu0 }
 0x18e   : > { %v951_v13 = vpop.f32.mrb[1].mxu0 }
 0x18f   : > { %v952_v11 = vadd.f32 %v951_v13, %v950_v51  ;;  %v953_v3 = vpop.f32.mrb[2].mxu0 }
 0x190   : > { %v954_v19 = vpop.f32.mrb[3].mxu0 }
 0x191   : > { %v955_v62 = vadd.f32 %v954_v19, %v953_v3  ;;  %v691_v42 = vadd.f32 %v952_v11, %v846_v4 }
 0x193   : > { %v692_v12 = vadd.f32 %v955_v62, %v846_v4  ;;  %v693_v8 = vsub.f32 0.0, %v691_v42 }
 0x195   : > { %v694_v58 = vsub.f32 0.0, %v692_v12  ;;  %v695_v59 = vmul.f32 0.00390625, %v693_v8 }
 0x197   : > { %v696_v41 = vmul.f32 0.00390625, %v694_v58  ;;  %697 = vst [vmem:[%s233_s19] sm:$0xff] %v695_v59 }
 0x199   : > { %698 = vst [vmem:[%s233_s19 + $0x8] sm:$0xff] %v696_v41 }
 0x19a   : > { %1234 = shalt.err (!%p1231_p9)
}
 0x19b   : > { %s1235_s4 = scalar_lea.hbm %s1870_s7, 256  ;;  %s1239_s29 = scalar_lea.hbm %s1923_s2, 512 }
 0x19c   : > { %p1236_p1 = scmp.ne.s32.totalorder %s1870_s7, %s1235_s4  ;;  %p1240_p5 = scmp.lt.u32.totalorder %s1870_s7, %s1923_s2 }
 0x19d   : > { %p1241_p4 = scmp.lt.u32.totalorder %s1239_s29, %s1235_s4  ;;  %p1243_p0 = scmp.lt.u32.totalorder %s1235_s4, %s1870_s7 }
 0x19e   : > { %p1237_p6 = pnand %p1236_p1, %p1966_p3 }
 0x19f   : > { %p1242_p8 = por %p1241_p4, %p1240_p5 }
 0x1a0   : > { %p1238_p2 = pneg %p1237_p6 }
 0x1a1   : > { %p1244_p11 = por %p1243_p0, %p1242_p8 }
 0x1a3   : > { %p1245_p13 = pnand %p1244_p11, %p1238_p2 }
 0x1a5   : > { %1248 = shalt.err (!%p1245_p13)
}
 0x1a6   : > { %s1317_s15 = smov 128   ;;  %s1318_s21 = smov 8  }
 0x1a7   : > { %960 = dma.vmem_to_hbm [thread:$0]  (%p1966_p3), %s1872_s26, 256, %s1870_s7, %s700_s8, %s1317_s15, %s1317_s15, %s1318_s21  }
 0x1a8 PF: > { %s729_s19 = sand.u32 1, %s1287_s9   ;;  %p1967_p7 = scmp.ne.s32.totalorder %s1944_s24, 0 }
 0x1a9   : > { %p1968_p10 = scmp.ge.s32.totalorder %s1307_s14, 2  ;;  %s730_s30 = scalar_lea.sflag [#allocation5], %s729_s19 }
 0x1ab   : > { %p970_p12 = pnand %p1968_p10, %p1967_p7 }
 0x1ad   : > { %1282 = dma.done.wait (!%p970_p12), %s730_s30, 256  }
 0x1ae   : > { %1284 = vsyncadd (!%p970_p12), %s730_s30, 4294967040  ;;  %s21_s14 = sadd.s32 1, %s1307_s14   ;;  %s1969_s9 = smov %s1291_s10 }
 0x1af   : > { %p18_p9 = scmp.ge.s32.totalorder %s21_s14, 4   ;;  %s1970_s10 = smov %s1295_s11 }
 0x1b0   : > { %s1971_s11 = smov %s1390_s23  ;;  %s1972_s12 = smov %s1303_s13 }
 0x1b1   : > { %s1973_s13 = smov %s1975_s17  ;;  %20 = sbr.rel (!%p18_p9) target bundleno = 8 (0x8), region = 94 }
 0x1b8   :  { %735 = vsyncpa [#allocation4], 1 }
 0x1b9   :  { %737 = vsyncpa [#allocation4 + $0x1], 1 }
 0x1ba   :  { %738 = vsyncpa [#allocation7], 1 }
 0x1bb   :  { %740 = vsyncpa [#allocation7 + $0x1], 1 }
 0x1bc   :  { %741 = vsyncpa [#allocation5], 1 }
 0x1bd   :  { %743 = vsyncpa [#allocation5 + $0x1], 1 }

</bundles_post_ra>
